<compile_context>
chip_gen: v7x
topology: tpu7x:2x2x1
jax: 0.10.0
libtpu: 0.0.40
codegen_flags: <defaults>
</compile_context>

<pallas_src>
import functools

import jax
import jax.numpy as jnp
from jax.experimental import pallas as pl
from jax.experimental.pallas import tpu as pltpu


# ------------------- rd weight rearrangement (tiny, plain JAX) ----------------

def make_rd_weight(w_oihw, theta):
    """Torch Conv2d_rd weight recombination.  w_oihw: (Cout, Cin, 5, 5)."""
    co, ci, kh, kw = w_oihw.shape
    assert kh == 5 and kw == 5, "Conv2d_rd rd-path is defined for 5x5 kernels"
    wf = w_oihw.reshape(co, ci, 25)
    outer = jnp.array([0, 2, 4, 10, 14, 20, 22, 24])
    mid = jnp.array([6, 7, 8, 11, 13, 16, 17, 18])
    rd = jnp.zeros_like(wf)
    rd = rd.at[:, :, outer].set(wf[:, :, outer] - wf[:, :, mid] * theta)
    rd = rd.at[:, :, mid].set(wf[:, :, mid] - wf[:, :, 12:13] * theta)
    rd = rd.at[:, :, 12].set(wf[:, :, 12] * (1.0 - theta))
    return rd.reshape(co, ci, 5, 5)


# ------------- fold dx taps + width padding into banded matmul weights --------

def build_banded_weights(w_oihw, W):
    """Per-kernel-row banded matrices (KH, W*Cin, W*Cout).

    out[h, w_out*Cout + co] += sum_{w_in, ci}
        band_dy[h, w_in*Cin + ci] * wmat[dy, w_in*Cin + ci, w_out*Cout + co]
    reproduces the SAME-padded (pad = KW//2) convolution over the width axis.
    """
    co, ci, KH, KW = w_oihw.shape
    pad = KW // 2
    w_hwio = jnp.transpose(w_oihw, (2, 3, 1, 0))          # (KH, KW, Cin, Cout)
    w_in = jnp.arange(W)[:, None]
    w_out = jnp.arange(W)[None, :]
    dx = w_in - w_out + pad                               # kernel column index
    valid = (dx >= 0) & (dx < KW)
    dx_c = jnp.clip(dx, 0, KW - 1)
    wm = w_hwio[:, dx_c, :, :]                            # (KH, Win, Wout, Cin, Cout)
    wm = jnp.where(valid[None, :, :, None, None], wm, 0.0)
    wm = jnp.transpose(wm, (0, 1, 3, 2, 4))               # (KH, Win, Cin, Wout, Cout)
    return wm.reshape(KH, W * ci, W * co)


# ----------------------------------- kernel -----------------------------------

def conv5_rd_kernel(x_ref, w_ref, o_ref, pad_ref, *, H, W, Cin, Cout, KH, PAD):
    # x_ref  : (1, H, W*Cin)        lane-dense input tile (one batch element)
    # w_ref  : (KH, W*Cin, W*Cout)  banded weight matrices (VMEM-resident)
    # o_ref  : (1, H, W*Cout)       lane-dense output tile
    # pad_ref: (H + 2*PAD, W*Cin)   VMEM scratch, rows zero-padded top/bottom
    WCin = W * Cin
    zeros_pad = jnp.zeros((PAD, WCin), jnp.float32)
    pad_ref[:PAD, :] = zeros_pad                          # top padding rows
    pad_ref[PAD + H:, :] = zeros_pad                      # bottom padding rows
    pad_ref[PAD:PAD + H, :] = x_ref[0]                    # interior, written once

    acc = jnp.zeros((H, W * Cout), jnp.float32)
    for dy in range(KH):                                  # KH MXU matmuls, K = W*Cin
        acc += jnp.dot(pad_ref[dy:dy + H, :], w_ref[dy],
                       preferred_element_type=jnp.float32)
    o_ref[0] = acc.astype(o_ref.dtype)


# ---------------------------------- wrapper -----------------------------------

def conv2d_rd_forward(x_nchw, weight_oihw, *, theta=1.0, bias=None):
    """Conv2d_rd.forward (stride=1, padding=2, dilation=1, groups=1)."""
    N, Cin, H, W = x_nchw.shape
    Cout, Cin_w, KH, KW = weight_oihw.shape
    assert Cin_w == Cin and KH == 5 and KW == 5
    # TODO(synk): stride>1 / dilation>1 / groups>1 nn.Conv2d variants are not
    # implemented (module defaults stride=1, padding=2, dilation=1, groups=1).

    if abs(float(theta)) < 1e-8:
        w_eff = weight_oihw                               # plain conv path
    else:
        w_eff = make_rd_weight(weight_oihw, float(theta))  # rd-weight path

    wmat = build_banded_weights(w_eff, W).astype(jnp.float32)   # (KH, W*Cin, W*Cout)
    x_flat = jnp.transpose(x_nchw, (0, 2, 3, 1)).reshape(N, H, W * Cin)
    x_flat = x_flat.astype(jnp.float32)

    flops = 2 * N * KH * H * (W * Cin) * (W * Cout)
    bytes_accessed = 4 * (int(x_flat.size) + int(wmat.size) + N * H * W * Cout)

    out_flat = pl.pallas_call(
        functools.partial(conv5_rd_kernel, H=H, W=W, Cin=Cin, Cout=Cout,
                          KH=KH, PAD=KW // 2),
        out_shape=jax.ShapeDtypeStruct((N, H, W * Cout), jnp.float32),
        grid=(N,),
        in_specs=[
            pl.BlockSpec((1, H, W * Cin), lambda n: (n, 0, 0)),
            pl.BlockSpec((KH, W * Cin, W * Cout), lambda n: (0, 0, 0)),
        ],
        out_specs=pl.BlockSpec((1, H, W * Cout), lambda n: (n, 0, 0)),
        scratch_shapes=[pltpu.VMEM((H + 2 * (KW // 2), W * Cin), jnp.float32)],
        compiler_params=pltpu.CompilerParams(
            dimension_semantics=("parallel",)),
        cost_estimate=pl.CostEstimate(flops=flops, transcendentals=0,
                                      bytes_accessed=bytes_accessed),
    )(x_flat, wmat)

    out = jnp.transpose(out_flat.reshape(N, H, W, Cout), (0, 3, 1, 2))
    if bias is not None:                                   # module default bias=False
        out = out + bias.reshape(1, Cout, 1, 1)
    return out


# ------------------------------------ main ------------------------------------

if __name__ == "__main__":
    N, Cin, Cout, H, W = 2, 8, 8, 16, 16                   # W*C = 128 -> lane-dense
    key = jax.random.PRNGKey(0)
    kx, kw = jax.random.split(key)
    x = jax.random.normal(kx, (N, Cin, H, W), jnp.float32)  # NCHW like PyTorch
    w = jax.random.normal(kw, (Cout, Cin, 5, 5), jnp.float32) * 0.2

    def ref_conv(xx, ww):
        return jax.lax.conv_general_dilated(
            xx, ww, window_strides=(1, 1), padding=((2, 2), (2, 2)),
            dimension_numbers=("NCHW", "OIHW", "NCHW"),
            precision=jax.lax.Precision.HIGHEST)

    # theta != 0 : radial-difference re-weighted conv
    out = jax.block_until_ready(conv2d_rd_forward(x, w, theta=1.0))
    ref = jax.block_until_ready(ref_conv(x, make_rd_weight(w, 1.0)))
    err = float(jnp.max(jnp.abs(out - ref)))
    assert out.shape == (N, Cout, H, W), out.shape
    assert err < 1e-3, f"theta=1.0 max abs err {err}"

    # theta == 0 : plain conv path
    out0 = jax.block_until_ready(conv2d_rd_forward(x, w, theta=0.0))
    ref0 = jax.block_until_ready(ref_conv(x, w))
    err0 = float(jnp.max(jnp.abs(out0 - ref0)))
    assert err0 < 1e-3, f"theta=0.0 max abs err {err0}"

    print("KERNEL_OK")
</pallas_src>

<mosaic_0001>
module attributes {stable_mosaic.version = 11 : i64} {
  func.func @conv5_rd_kernel(%arg0: i32, %arg1: memref<1x16x128xf32, #tpu.memory_space<vmem>>, %arg2: memref<5x128x128xf32, #tpu.memory_space<vmem>>, %arg3: memref<1x16x128xf32, #tpu.memory_space<vmem>>, %arg4: memref<20x128xf32, #tpu.memory_space<vmem>>) attributes {dimension_semantics = [#tpu.dimension_semantics<parallel>], iteration_bounds = array<i64: 2>, scalar_prefetch = 0 : i64, scratch_operands = 1 : i64, tpu.core_type = #tpu.core_type<tc>, window_params = [{transform_indices = @transform_0, window_bounds = array<i64: 1, 16, 128>}, {pipeline_mode = #tpu.pipeline_mode<synchronous>, transform_indices = @transform_1, window_bounds = array<i64: 5, 128, 128>}, {transform_indices = @transform_2, window_bounds = array<i64: 1, 16, 128>}]} {
    %cst = arith.constant 0.000000e+00 : f32
    %0 = vector.broadcast %cst : f32 to vector<2x128xf32>
    %c0 = arith.constant 0 : index
    %c0_0 = arith.constant 0 : index
    %1 = vector.load %arg4[%c0, %c0_0] : memref<20x128xf32, #tpu.memory_space<vmem>>, vector<2x128xf32>
    tpu.vector_store %arg4[%c0, %c0_0], %0 {strides = array<i32>} : memref<20x128xf32, #tpu.memory_space<vmem>>, vector<2x128xf32>,
    %c18 = arith.constant 18 : index
    %c0_1 = arith.constant 0 : index
    %2 = vector.load %arg4[%c18, %c0_1] : memref<20x128xf32, #tpu.memory_space<vmem>>, vector<2x128xf32>
    tpu.vector_store %arg4[%c18, %c0_1], %0 {strides = array<i32>} : memref<20x128xf32, #tpu.memory_space<vmem>>, vector<2x128xf32>,
    %c0_2 = arith.constant 0 : index
    %c0_3 = arith.constant 0 : index
    %c0_4 = arith.constant 0 : index
    %3 = vector.load %arg1[%c0_2, %c0_3, %c0_4] : memref<1x16x128xf32, #tpu.memory_space<vmem>>, vector<1x16x128xf32>
    %4 = vector.shape_cast %3 : vector<1x16x128xf32> to vector<16x128xf32>
    %c2 = arith.constant 2 : index
    %c0_5 = arith.constant 0 : index
    %5 = vector.load %arg4[%c2, %c0_5] : memref<20x128xf32, #tpu.memory_space<vmem>>, vector<16x128xf32>
    tpu.vector_store %arg4[%c2, %c0_5], %4 {strides = array<i32>} : memref<20x128xf32, #tpu.memory_space<vmem>>, vector<16x128xf32>,
    %cst_6 = arith.constant 0.000000e+00 : f32
    %6 = vector.broadcast %cst_6 : f32 to vector<16x128xf32>
    %c0_7 = arith.constant 0 : index
    %c0_8 = arith.constant 0 : index
    %7 = vector.load %arg4[%c0_7, %c0_8] : memref<20x128xf32, #tpu.memory_space<vmem>>, vector<16x128xf32>
    %c0_9 = arith.constant 0 : index
    %c0_10 = arith.constant 0 : index
    %c0_11 = arith.constant 0 : index
    %8 = vector.load %arg2[%c0_9, %c0_10, %c0_11] : memref<5x128x128xf32, #tpu.memory_space<vmem>>, vector<1x128x128xf32>
    %9 = vector.shape_cast %8 : vector<1x128x128xf32> to vector<128x128xf32>
    %cst_12 = arith.constant dense<0.000000e+00> : vector<16x128xf32>
    %10 = tpu.matmul %7, %9, %cst_12 {dimension_numbers = #tpu.dot_dimension_numbers<[1], [0], [0], [1], [0, 0, 1, 1], [], []>} : vector<16x128xf32>, vector<128x128xf32>, vector<16x128xf32> -> vector<16x128xf32>
    %11 = arith.addf %6, %10 : vector<16x128xf32>
    %c1 = arith.constant 1 : index
    %c0_13 = arith.constant 0 : index
    %12 = vector.load %arg4[%c1, %c0_13] : memref<20x128xf32, #tpu.memory_space<vmem>>, vector<16x128xf32>
    %c1_14 = arith.constant 1 : index
    %c0_15 = arith.constant 0 : index
    %c0_16 = arith.constant 0 : index
    %13 = vector.load %arg2[%c1_14, %c0_15, %c0_16] : memref<5x128x128xf32, #tpu.memory_space<vmem>>, vector<1x128x128xf32>
    %14 = vector.shape_cast %13 : vector<1x128x128xf32> to vector<128x128xf32>
    %cst_17 = arith.constant dense<0.000000e+00> : vector<16x128xf32>
    %15 = tpu.matmul %12, %14, %cst_17 {dimension_numbers = #tpu.dot_dimension_numbers<[1], [0], [0], [1], [0, 0, 1, 1], [], []>} : vector<16x128xf32>, vector<128x128xf32>, vector<16x128xf32> -> vector<16x128xf32>
    %16 = arith.addf %11, %15 : vector<16x128xf32>
    %c2_18 = arith.constant 2 : index
    %c0_19 = arith.constant 0 : index
    %17 = vector.load %arg4[%c2_18, %c0_19] : memref<20x128xf32, #tpu.memory_space<vmem>>, vector<16x128xf32>
    %c2_20 = arith.constant 2 : index
    %c0_21 = arith.constant 0 : index
    %c0_22 = arith.constant 0 : index
    %18 = vector.load %arg2[%c2_20, %c0_21, %c0_22] : memref<5x128x128xf32, #tpu.memory_space<vmem>>, vector<1x128x128xf32>
    %19 = vector.shape_cast %18 : vector<1x128x128xf32> to vector<128x128xf32>
    %cst_23 = arith.constant dense<0.000000e+00> : vector<16x128xf32>
    %20 = tpu.matmul %17, %19, %cst_23 {dimension_numbers = #tpu.dot_dimension_numbers<[1], [0], [0], [1], [0, 0, 1, 1], [], []>} : vector<16x128xf32>, vector<128x128xf32>, vector<16x128xf32> -> vector<16x128xf32>
    %21 = arith.addf %16, %20 : vector<16x128xf32>
    %c3 = arith.constant 3 : index
    %c0_24 = arith.constant 0 : index
    %22 = vector.load %arg4[%c3, %c0_24] : memref<20x128xf32, #tpu.memory_space<vmem>>, vector<16x128xf32>
    %c3_25 = arith.constant 3 : index
    %c0_26 = arith.constant 0 : index
    %c0_27 = arith.constant 0 : index
    %23 = vector.load %arg2[%c3_25, %c0_26, %c0_27] : memref<5x128x128xf32, #tpu.memory_space<vmem>>, vector<1x128x128xf32>
    %24 = vector.shape_cast %23 : vector<1x128x128xf32> to vector<128x128xf32>
    %cst_28 = arith.constant dense<0.000000e+00> : vector<16x128xf32>
    %25 = tpu.matmul %22, %24, %cst_28 {dimension_numbers = #tpu.dot_dimension_numbers<[1], [0], [0], [1], [0, 0, 1, 1], [], []>} : vector<16x128xf32>, vector<128x128xf32>, vector<16x128xf32> -> vector<16x128xf32>
    %26 = arith.addf %21, %25 : vector<16x128xf32>
    %c4 = arith.constant 4 : index
    %c0_29 = arith.constant 0 : index
    %27 = vector.load %arg4[%c4, %c0_29] : memref<20x128xf32, #tpu.memory_space<vmem>>, vector<16x128xf32>
    %c4_30 = arith.constant 4 : index
    %c0_31 = arith.constant 0 : index
    %c0_32 = arith.constant 0 : index
    %28 = vector.load %arg2[%c4_30, %c0_31, %c0_32] : memref<5x128x128xf32, #tpu.memory_space<vmem>>, vector<1x128x128xf32>
    %29 = vector.shape_cast %28 : vector<1x128x128xf32> to vector<128x128xf32>
    %cst_33 = arith.constant dense<0.000000e+00> : vector<16x128xf32>
    %30 = tpu.matmul %27, %29, %cst_33 {dimension_numbers = #tpu.dot_dimension_numbers<[1], [0], [0], [1], [0, 0, 1, 1], [], []>} : vector<16x128xf32>, vector<128x128xf32>, vector<16x128xf32> -> vector<16x128xf32>
    %31 = arith.addf %26, %30 : vector<16x128xf32>
    %c0_34 = arith.constant 0 : index
    %c0_35 = arith.constant 0 : index
    %c0_36 = arith.constant 0 : index
    %32 = vector.load %arg3[%c0_34, %c0_35, %c0_36] : memref<1x16x128xf32, #tpu.memory_space<vmem>>, vector<1x16x128xf32>
    %33 = vector.shape_cast %32 : vector<1x16x128xf32> to vector<16x128xf32>
    %34 = vector.shape_cast %31 : vector<16x128xf32> to vector<1x16x128xf32>
    tpu.vector_store %arg3[%c0_34, %c0_35, %c0_36], %34 {strides = array<i32>} : memref<1x16x128xf32, #tpu.memory_space<vmem>>, vector<1x16x128xf32>,
    return
  }
  func.func @transform_0(%arg0: i32) -> (i32, i32, i32) {
    %c0_i32 = arith.constant 0 : i32
    %c0_i32_0 = arith.constant 0 : i32
    %c0_i32_1 = arith.constant 0 : i32
    return %arg0, %c0_i32, %c0_i32_0 : i32, i32, i32
  }
  func.func @transform_1(%arg0: i32) -> (i32, i32, i32) {
    %c0_i32 = arith.constant 0 : i32
    %c0_i32_0 = arith.constant 0 : i32
    %c0_i32_1 = arith.constant 0 : i32
    %c0_i32_2 = arith.constant 0 : i32
    return %c0_i32, %c0_i32_0, %c0_i32_1 : i32, i32, i32
  }
  func.func @transform_2(%arg0: i32) -> (i32, i32, i32) {
    %c0_i32 = arith.constant 0 : i32
    %c0_i32_0 = arith.constant 0 : i32
    %c0_i32_1 = arith.constant 0 : i32
    return %arg0, %c0_i32, %c0_i32_0 : i32, i32, i32
  }
}

</mosaic_0001>

<bundles_post_ra>
// kernel: tpu_custom_call.1
= control target key start
LH: loop header
LB: loop body
LE: loop exit
PB: predicated region body
PF: predicated region fallthrough
CT: control target
= control target key end

     0   :  { %7 = vsyncpa [#allocation4], 0  ;;  %s1642_s0 = inlined_call_operand.hbm [shape: f32[2,16,128], index: 0, kind: input, shape index: {}]   ;;  %s1643_s1 = inlined_call_operand.hbm [shape: f32[5,128,128], index: 1, kind: input, shape index: {}]   ;;  %s1644_s2 = inlined_call_operand.hbm [shape: f32[2,16,128], index: 2, kind: output, shape index: {}]  }
   0x1   :  { %9 = vsyncpa [#allocation4 + $0x1], 0 }
   0x2   :  { %10 = vsyncpa [#allocation7], 0 }
   0x3   :  { %11 = vsyncpa [#allocation5], 0 }
   0x4   :  { %13 = vsyncpa [#allocation5 + $0x1], 0  ;;  %s1423_s9 = smov 0   ;;  %s1425_s10 = smov 0  }
   0x5   :  { %s1427_s11 = smov 0   ;;  %s1429_s12 = smov 0  }
   0x6 LB: > { %s1444_s13 = sadd.s32 4294967295, %s1398_s12   ;;  %s757_s14 = sadd.s32 4294967294, %s1398_s12   ;;  %s1398_s12 = sphi %s1429_s12, %s1664_s12   ;;  %s1394_s11 = sphi %s1427_s11, %s1663_s11   ;;  %s1390_s10 = sphi %s1425_s10, %s1662_s10   ;;  %s1386_s9 = sphi %s1423_s9, %s1661_s9  }
   0x7   : > { %p39_p0 = scmp.ne.s32.totalorder %s1390_s10, %s1386_s9  ;;  %p1645_p1 = scmp.eq.s32.totalorder %s1444_s13, 0 }
   0x8   : > { %p90_p3 = scmp.eq.s32.totalorder %s757_s14, 1  ;;  %p758_p5 = scmp.ge.s32.totalorder %s1398_s12, 1 }
   0x9   : > { %p1453_p4 = por %p1645_p1, %p39_p0  ;;  %p97_p7 = scmp.lt.s32.totalorder %s1398_s12, 3 }
   0xa   : > { %p1458_p6 = por %p90_p3, %p39_p0  ;;  %s1400_s18 = smov [#allocation6]  }
   0xb   : > { %s1648_s15 = scalar_select %p1453_p4, 1, 0 }
   0xc   : > { %s1649_s16 = scalar_select %p1458_p6, 1, 0 }
   0xd   : > { %p1463_p8 = pnand %p758_p5, %p97_p7  ;;  %s109_s19 = sshll.u32 %s1400_s18, 4  ;;  %s1467_s19 = int_to_ptr.vmem [resolvable:$true] %s109_s19 }
   0xe   : > { %s1479_s21 = sadd.s32 1, %s1398_s12   ;;  %s26_s22 = sadd.s32 1, %s1394_s11 }
   0xf   : > { %s1650_s17 = scalar_select %p1463_p8, 1, 0 }
  0x10   : > { %p1216_p9 = pneg %p1463_p8  ;;  %s23_s23 = ssub.s32 %s1398_s12, %s1479_s21 }
  0x11   : > { %s1270_s26 = scalar_lea.hbm %s1643_s1, 10240 }
  0x12   : > { %p1474_p11 = pnand %p1216_p9, %p1645_p1  ;;  %p1271_p12 = scmp.ne.s32.totalorder %s1643_s1, %s1270_s26 }
  0x13   : > { %p1277_p5 = scmp.lt.u32.totalorder %s1270_s26, %s1643_s1 }
  0x14   : > { %p1272_p13 = pneg %p1474_p11 }
  0x16   : > { %p1273_p0 = pnand %p1272_p13, %p1271_p12 }
  0x18   : > { %p1274_p3 = pneg %p1273_p0 }
  0x1a   : > { %p1279_p7 = pnand %p1277_p5, %p1274_p3 }
  0x1c   : > { %1282 = shalt.err (!%p1279_p7)
}
  0x1d   : > { %s1283_s3 = scalar_lea.vmem %s1467_s19, 10240  ;;  %p1291_p2 = scmp.lt.s32.totalorder %s1467_s19, %s1467_s19 }
  0x1e   : > { %p1284_p9 = scmp.ne.s32.totalorder %s1467_s19, %s1283_s3  ;;  %p1292_p6 = scmp.lt.s32.totalorder %s1283_s3, %s1283_s3 }
  0x20   : > { %p1286_p10 = pnand %p1284_p9, %p1272_p13  ;;  %p1293_p4 = por %p1292_p6, %p1291_p2 }
  0x22   : > { %p1287_p1 = pneg %p1286_p10 }
  0x24   : > { %p1294_p8 = pnand %p1293_p4, %p1287_p1 }
  0x26   : > { %1297 = shalt.err (!%p1294_p8)
}
  0x27   : > { %s1401_s4 = smov 128   ;;  %s1402_s5 = smov 8  }
  0x28   : > { %1219 = dma.hbm_to_vmem [thread:$0]  (!%p1474_p11), %s1643_s1, 10240, %s1467_s19, [#allocation7], %s1401_s4, %s1401_s4, %s1402_s5  }
  0x29   : > { %p24_p1 = scmp.eq.s32.totalorder %s23_s23, 0  ;;  %p33_p2 = scmp.ne.s32.totalorder %s1394_s11, %s1390_s10 }
  0x2a   : > { %p34_p4 = scmp.eq.s32.totalorder %s1398_s12, 0  ;;  %p1229_p6 = scmp.lt.s32.totalorder %s1398_s12, 2 }
  0x2b   : > { %s1513_s8 = scalar_select %p24_p1, %s1394_s11, %s26_s22  }
  0x2c   : > { %p35_p8 = por %p34_p4, %p33_p2  ;;  %p1652_p10 = scmp.eq.s32.totalorder %s1444_s13, 1 }
  0x2d   : > { %s123_s18 = sand.u32 1, %s1394_s11   ;;  %s773_s20 = sshll.u32 %s1398_s12, 8 }
  0x2e   : > { %p1517_p12 = por %p1652_p10, %p33_p2  ;;  %s761_s24 = sshll.u32 %s123_s18, 4 }
  0x2f   : > { %s1526_s27 = scalar_lea.hbm %s1642_s0, %s773_s20  ;;  %s127_s19 = scalar_lea.vmem [#allocation3], %s761_s24 }
  0x30   : > { %s134_s22 = sshll.u32 %s127_s19, 4  ;;  %p1528_p11 = pnand %p1229_p6, %p35_p8  ;;  %s1532_s22 = int_to_ptr.vmem [resolvable:$true] %s134_s22 }
  0x31   : > { %s1534_s28 = scalar_lea.sflag [#allocation4], %s123_s18  ;;  %s1298_s29 = scalar_lea.hbm %s1526_s27, 256 }
  0x32   : > { %p1299_p13 = scmp.ne.s32.totalorder %s1526_s27, %s1298_s29  ;;  %p1300_p0 = pneg %p1528_p11 }
  0x33   : > { %s1303_s6 = scalar_lea.hbm %s1642_s0, 512  ;;  %p1304_p7 = scmp.lt.u32.totalorder %s1526_s27, %s1642_s0 }
  0x34   : > { %p1301_p3 = pnand %p1300_p0, %p1299_p13  ;;  %p1305_p9 = scmp.lt.u32.totalorder %s1303_s6, %s1298_s29 }
  0x35   : > { %p1307_p2 = scmp.lt.u32.totalorder %s1298_s29, %s1526_s27 }
  0x36   : > { %p1302_p5 = pneg %p1301_p3  ;;  %p1306_p1 = por %p1305_p9, %p1304_p7 }
  0x38   : > { %p1308_p4 = por %p1307_p2, %p1306_p1 }
  0x3a   : > { %p1309_p6 = pnand %p1308_p4, %p1302_p5 }
  0x3c   : > { %1312 = shalt.err (!%p1309_p6)
}
  0x3d   : > { %s1313_s18 = scalar_lea.vmem %s1532_s22, 256  ;;  %s1403_s24 = smov [#allocation3]  }
  0x3e   : > { %p1314_p8 = scmp.ne.s32.totalorder %s1532_s22, %s1313_s18  ;;  %s1318_s25 = sshll.u32 %s1403_s24, 4  ;;  %s1319_s25 = int_to_ptr.vmem [resolvable:$false] %s1318_s25 }
  0x3f   : > { %s1320_s26 = scalar_lea.vmem %s1319_s25, 512  ;;  %p1321_p3 = scmp.lt.s32.totalorder %s1532_s22, %s1319_s25 }
  0x40   : > { %p1316_p10 = pnand %p1314_p8, %p1300_p0  ;;  %p1322_p7 = scmp.lt.s32.totalorder %s1320_s26, %s1313_s18 }
  0x42   : > { %p1317_p13 = pneg %p1316_p10  ;;  %p1323_p9 = por %p1322_p7, %p1321_p3 }
  0x44   : > { %p1324_p1 = pnand %p1323_p9, %p1317_p13 }
  0x46   : > { %1327 = shalt.err (!%p1324_p1)
}
  0x47   : > { %1223 = dma.hbm_to_vmem [thread:$0]  (!%p1528_p11), %s1526_s27, 256, %s1532_s22, %s1534_s28, %s1401_s4, %s1401_s4, %s1402_s5  }
  0x48   : > { %p1655_p0 = scmp.ne.s32.totalorder %s1650_s17, 0 }
  0x49   : > { %s1568_s19 = sand.u32 (!%p1655_p0), 1, %s1390_s10   ;;  %p1656_p5 = scmp.ne.s32.totalorder (!%p1655_p0), %s1648_s15, 0 }
  0x4a   : > { %146 = sbr.rel (%p1655_p0) target bundleno = 415 (0x19f), region = 28  ;;  %s765_s29 = sshll.u32 (!%p1655_p0), %s1568_s19, 4 }
  0x4b   : > { %s149_s30 = scalar_lea.sflag (!%p1655_p0), [#allocation4], %s1568_s19  ;;  %s1574_s23 = scalar_lea.vmem (!%p1655_p0), [#allocation3], %s765_s29 }
  0x51   : > { %1373 = dma.done.wait (%p1656_p5), %s149_s30, 256  }
  0x52   : > { %1375 = vsyncadd (%p1656_p5), %s149_s30, 4294967040  ;;  %p1657_p11 = scmp.eq.s32.totalorder %s1444_s13, 0 }
  0x54   : > { %1377 = dma.done.wait (%p1657_p11), [#allocation7], 10240   ;;  %p1658_p2 = pmov %p1657_p11 }
  0x55   : > { %v1404_v0 = vmov 0.0   ;;  %v204_v1 = vld [vmem:[#allocation6 + $0x80] sm:$0xff]  ;;  %v205_v2 = vld [vmem:[#allocation6 + $0x88] sm:$0xff]  ;;  %v206_v6 = vld [vmem:[#allocation6 + $0x90] sm:$0xff]  ;;  %s176_s15 = scalar_lea.vmem [#allocation8], %s765_s29  ;;  %s774_s4 = sshll.u32 %s1444_s13, 8 }
  0x56   : > { %1379 = vsyncadd (%p1658_p2), [#allocation7], 4294957056  ;;  %177 = vst [vmem:[#allocation2] sm:$0x3] %v1404_v0  ;;  %v373_v3 = vld [vmem:[#allocation6 + $0x100] sm:$0xff]  ;;  %v1040_v4 = vpack.c.bf16 %v205_v2, %v204_v1  ;;  %v374_v5 = vld [vmem:[#allocation6 + $0x108] sm:$0xff]  ;;  %s1598_s22 = scalar_lea.hbm %s1644_s2, %s774_s4 }
  0x57   : > { %178 = vst [vmem:[#allocation2 + $0x12] sm:$0x3] %v1404_v0  ;;  %v207_v7 = vld [vmem:[#allocation6 + $0x98] sm:$0xff]  ;;  %v1104_v8 = vpack.c.bf16 %v374_v5, %v373_v3  ;;  %v375_v10 = vld [vmem:[#allocation6 + $0x110] sm:$0xff]  ;;  %v208_v12 = vld [vmem:[#allocation6 + $0xa0] sm:$0xff]  ;;  %s674_s17 = sshll.u32 %s176_s15, 4  ;;  %s1593_s17 = int_to_ptr.vmem [resolvable:$true] %s674_s17 }
  0x58   : > { %v1044_v9 = vpack.c.bf16 %v207_v7, %v206_v6  ;;  %v376_v11 = vld [vmem:[#allocation6 + $0x118] sm:$0xff]  ;;  %1041 = vmatprep.subr.bf16.mxu1 %v1040_v4  ;;  %v209_v14 = vld [vmem:[#allocation6 + $0xa8] sm:$0xff]  ;;  %v377_v15 = vld [vmem:[#allocation6 + $0x120] sm:$0xff]  ;;  %s661_s28 = scalar_lea.sflag [#allocation5], %s1568_s19  ;;  %s1328_s3 = scalar_lea.vmem %s1593_s17, 256 }
  0x59   : > { %v1108_v13 = vpack.c.bf16 %v376_v11, %v375_v10  ;;  %v378_v16 = vld [vmem:[#allocation6 + $0x128] sm:$0xff]  ;;  %1105 = vmatprep.subr.bf16.mxu0 %v1104_v8  ;;  %1043 = vmatpush3.bf16.msra.mxu1 %v1040_v4  ;;  %v1048_v17 = vpack.c.bf16 %v209_v14, %v208_v12  ;;  %v210_v19 = vld [vmem:[#allocation6 + $0xb0] sm:$0xff]  ;;  %v211_v20 = vld [vmem:[#allocation6 + $0xb8] sm:$0xff]  ;;  %p1329_p4 = scmp.ne.s32.totalorder %s1593_s17, %s1328_s3  ;;  %s1405_s13 = smov [#allocation8]  }
  0x5a   : > { %1107 = vmatpush3.bf16.msra.mxu0 %v1104_v8  ;;  %1045 = vmatprep.subr.bf16.mxu1 %v1044_v9  ;;  %v1112_v18 = vpack.c.bf16 %v378_v16, %v377_v15  ;;  %v379_v21 = vld [vmem:[#allocation6 + $0x130] sm:$0xff]  ;;  %v380_v22 = vld [vmem:[#allocation6 + $0x138] sm:$0xff]  ;;  %v1052_v23 = vpack.c.bf16 %v211_v20, %v210_v19  ;;  %v212_v25 = vld [vmem:[#allocation6 + $0xc0] sm:$0xff]  ;;  %s1332_s6 = sshll.u32 %s1405_s13, 4  ;;  %s1333_s6 = int_to_ptr.vmem [resolvable:$false] %s1332_s6 }
  0x5b   : > { %1109 = vmatprep.subr.bf16.mxu0 %v1108_v13  ;;  %v1116_v24 = vpack.c.bf16 %v380_v22, %v379_v21  ;;  %v213_v26 = vld [vmem:[#allocation6 + $0xc8] sm:$0xff]  ;;  %v179_v27 = vld [vmem:[%s1574_s23] sm:$0xff]  ;;  %v215_v34 = vld [vmem:[#allocation6 + $0xd8] sm:$0xff]  ;;  %p1330_p6 = pnand %p1329_p4, %p1517_p12  ;;  %s1334_s7 = scalar_lea.vmem %s1333_s6, 512 }
  0x5c   : > { %v381_v28 = vld [vmem:[#allocation6 + $0x140] sm:$0xff]  ;;  %v382_v29 = vld [vmem:[#allocation6 + $0x148] sm:$0xff]  ;;  %181 = vst [vmem:[#allocation2 + $0x2] sm:$0xff] %v179_v27  ;;  %967 = vmatprep.mubr.f32.mxu0 %v179_v27  ;;  %v1056_v31 = vpack.c.bf16 %v213_v26, %v212_v25  ;;  %v214_v33 = vld [vmem:[#allocation6 + $0xd0] sm:$0xff]  ;;  %p1335_p10 = scmp.lt.s32.totalorder %s1593_s17, %s1333_s6  ;;  %p1336_p13 = scmp.lt.s32.totalorder %s1334_s7, %s1328_s3 }
  0x5d   : > { %1047 = vmatpush3.bf16.msra.mxu1 %v1044_v9  ;;  %v1586_v30 = vld [vmem:[%s1574_s23 + $0x8] sm:$0xff]  ;;  %v1120_v32 = vpack.c.bf16 %v382_v29, %v381_v28  ;;  %v383_v35 = vld [vmem:[#allocation6 + $0x150] sm:$0xff]  ;;  %v1060_v37 = vpack.c.bf16 %v215_v34, %v214_v33  ;;  %v216_v39 = vld [vmem:[#allocation6 + $0xe0] sm:$0xff]  ;;  %p1331_p8 = pneg %p1330_p6 }
  0x5e   : > { %1111 = vmatpush3.bf16.msra.mxu0 %v1108_v13  ;;  %1049 = vmatprep.subr.bf16.mxu1 %v1048_v17  ;;  %182 = vst [vmem:[#allocation2 + $0xa] sm:$0xff] %v1586_v30  ;;  %v384_v36 = vld [vmem:[#allocation6 + $0x158] sm:$0xff]  ;;  %v217_v40 = vld [vmem:[#allocation6 + $0xe8] sm:$0xff]  ;;  %v385_v42 = vld [vmem:[#allocation6 + $0x160] sm:$0xff]  ;;  %p1337_p3 = por %p1336_p13, %p1335_p10 }
  0x5f   : > { %1113 = vmatprep.subr.bf16.mxu0 %v1112_v18  ;;  %v1124_v38 = vpack.c.bf16 %v384_v36, %v383_v35  ;;  %v386_v43 = vld [vmem:[#allocation6 + $0x168] sm:$0xff]  ;;  %v1064_v44 = vpack.c.bf16 %v217_v40, %v216_v39  ;;  %v218_v46 = vld [vmem:[#allocation6 + $0xf0] sm:$0xff]  ;;  %v219_v47 = vld [vmem:[#allocation6 + $0xf8] sm:$0xff] }
  0x60   : > { %v1128_v45 = vpack.c.bf16 %v386_v43, %v385_v42  ;;  %v387_v48 = vld [vmem:[#allocation6 + $0x170] sm:$0xff]  ;;  %v388_v49 = vld [vmem:[#allocation6 + $0x178] sm:$0xff]  ;;  %v1068_v50 = vpack.c.bf16 %v219_v47, %v218_v46  ;;  %v185_v52 = vld [vmem:[#allocation6] sm:$0xff]  ;;  %p1338_p7 = pnand %p1337_p3, %p1331_p8 }
  0x61   : > { %1051 = vmatpush3.bf16.msra.mxu1 %v1048_v17  ;;  %v1132_v51 = vpack.c.bf16 %v388_v49, %v387_v48  ;;  %v186_v53 = vld [vmem:[#allocation6 + $0x8] sm:$0xff]  ;;  %v469_v54 = vld [vmem:[#allocation6 + $0x180] sm:$0xff]  ;;  %v187_v58 = vld [vmem:[#allocation6 + $0x10] sm:$0xff] }
  0x62   : > { %1115 = vmatpush3.bf16.msra.mxu0 %v1112_v18  ;;  %1053 = vmatprep.subr.bf16.mxu1 %v1052_v23  ;;  %v470_v55 = vld [vmem:[#allocation6 + $0x188] sm:$0xff]  ;;  %v1072_v56 = vpack.c.bf16 %v186_v53, %v185_v52  ;;  %v188_v59 = vld [vmem:[#allocation6 + $0x18] sm:$0xff]  ;;  %v471_v60 = vld [vmem:[#allocation6 + $0x190] sm:$0xff] }
  0x63   : > { %1117 = vmatprep.subr.bf16.mxu0 %v1116_v24  ;;  %v201_v41 = vld [vmem:[#allocation2 + $0x1] sm:$0xff]  ;;  %v1136_v57 = vpack.c.bf16 %v470_v55, %v469_v54  ;;  %v472_v61 = vld [vmem:[#allocation6 + $0x198] sm:$0xff]  ;;  %v1076_v63 = vpack.c.bf16 %v188_v59, %v187_v58  ;;  %v189_v1 = vld [vmem:[#allocation6 + $0x20] sm:$0xff] }
  0x64   : > { %897 = vmatprep.mubr.f32.mxu1 %v201_v41  ;;  %v1140_v0 = vpack.c.bf16 %v472_v61, %v471_v60  ;;  %v190_v2 = vld [vmem:[#allocation6 + $0x28] sm:$0xff]  ;;  %v473_v3 = vld [vmem:[#allocation6 + $0x1a0] sm:$0xff]  ;;  %v191_v9 = vld [vmem:[#allocation6 + $0x30] sm:$0xff] }
  0x65   : > { %1055 = vmatpush3.bf16.msra.mxu1 %v1052_v23  ;;  %v202_v62 = vld [vmem:[#allocation2 + $0x9] sm:$0xff]  ;;  %v474_v4 = vld [vmem:[#allocation6 + $0x1a8] sm:$0xff]  ;;  %v1080_v7 = vpack.c.bf16 %v190_v2, %v189_v1  ;;  %v193_v15 = vld [vmem:[#allocation6 + $0x40] sm:$0xff] }
  0x66   : > { %1119 = vmatpush3.bf16.msra.mxu0 %v1116_v24  ;;  %1057 = vmatprep.subr.bf16.mxu1 %v1056_v31  ;;  %v183_v5 = vld [vmem:[#allocation2] sm:$0xff]  ;;  %v1144_v8 = vpack.c.bf16 %v474_v4, %v473_v3  ;;  %v192_v10 = vld [vmem:[#allocation6 + $0x38] sm:$0xff]  ;;  %v475_v11 = vld [vmem:[#allocation6 + $0x1b0] sm:$0xff] }
  0x67   : > { %1121 = vmatprep.subr.bf16.mxu0 %v1120_v32  ;;  %v466_v6 = vld [vmem:[#allocation2 + $0x3] sm:$0xff]  ;;  %v476_v12 = vld [vmem:[#allocation6 + $0x1b8] sm:$0xff]  ;;  %v1084_v13 = vpack.c.bf16 %v192_v10, %v191_v9  ;;  %v477_v17 = vld [vmem:[#allocation6 + $0x1c0] sm:$0xff] }
  0x68   : > { %v1148_v14 = vpack.c.bf16 %v476_v12, %v475_v11  ;;  %v194_v16 = vld [vmem:[#allocation6 + $0x48] sm:$0xff]  ;;  %v195_v21 = vld [vmem:[#allocation6 + $0x50] sm:$0xff]  ;;  %v196_v22 = vld [vmem:[#allocation6 + $0x58] sm:$0xff] }
  0x69   : > { %1059 = vmatpush3.bf16.msra.mxu1 %v1056_v31  ;;  %v478_v18 = vld [vmem:[#allocation6 + $0x1c8] sm:$0xff]  ;;  %v1088_v19 = vpack.c.bf16 %v194_v16, %v193_v15  ;;  %v479_v23 = vld [vmem:[#allocation6 + $0x1d0] sm:$0xff]  ;;  %v480_v24 = vld [vmem:[#allocation6 + $0x1d8] sm:$0xff]  ;;  %v1092_v25 = vpack.c.bf16 %v196_v22, %v195_v21 }
  0x6a   : > { %1123 = vmatpush3.bf16.msra.mxu0 %v1120_v32  ;;  %1061 = vmatprep.subr.bf16.mxu1 %v1060_v37  ;;  %v1152_v20 = vpack.c.bf16 %v478_v18, %v477_v17  ;;  %v1156_v26 = vpack.c.bf16 %v480_v24, %v479_v23  ;;  %v197_v27 = vld [vmem:[#allocation6 + $0x60] sm:$0xff]  ;;  %v198_v28 = vld [vmem:[#allocation6 + $0x68] sm:$0xff]  ;;  %v199_v33 = vld [vmem:[#allocation6 + $0x70] sm:$0xff] }
  0x6b   : > { %1125 = vmatprep.subr.bf16.mxu0 %v1124_v38  ;;  %v481_v29 = vld [vmem:[#allocation6 + $0x1e0] sm:$0xff]  ;;  %v1096_v31 = vpack.c.bf16 %v198_v28, %v197_v27  ;;  %v200_v34 = vld [vmem:[#allocation6 + $0x78] sm:$0xff]  ;;  %v483_v35 = vld [vmem:[#allocation6 + $0x1f0] sm:$0xff] }
  0x6c   : > { %v484_v36 = vld [vmem:[#allocation6 + $0x1f8] sm:$0xff]  ;;  %v565_v39 = vld [vmem:[#allocation6 + $0x200] sm:$0xff]  ;;  %v566_v40 = vld [vmem:[#allocation6 + $0x208] sm:$0xff] }
  0x6d   : > { %1063 = vmatpush3.bf16.msra.mxu1 %v1060_v37  ;;  %v1100_v37 = vpack.c.bf16 %v200_v34, %v199_v33  ;;  %v1168_v41 = vpack.c.bf16 %v566_v40, %v565_v39  ;;  %v567_v42 = vld [vmem:[#allocation6 + $0x210] sm:$0xff]  ;;  %v568_v43 = vld [vmem:[#allocation6 + $0x218] sm:$0xff]  ;;  %v569_v48 = vld [vmem:[#allocation6 + $0x220] sm:$0xff] }
  0x6e   : > { %1127 = vmatpush3.bf16.msra.mxu0 %v1124_v38  ;;  %1065 = vmatprep.subr.bf16.mxu1 %v1064_v44  ;;  %v1164_v38 = vpack.c.bf16 %v484_v36, %v483_v35  ;;  %v1172_v46 = vpack.c.bf16 %v568_v43, %v567_v42  ;;  %v562_v47 = vld [vmem:[#allocation2 + $0x4] sm:$0xff]  ;;  %v572_v52 = vld [vmem:[#allocation6 + $0x238] sm:$0xff]  ;;  %v573_v54 = vld [vmem:[#allocation6 + $0x240] sm:$0xff] }
  0x6f   : > { %1129 = vmatprep.subr.bf16.mxu0 %v1128_v45  ;;  %v570_v49 = vld [vmem:[#allocation6 + $0x228] sm:$0xff]  ;;  %v576_v58 = vld [vmem:[#allocation6 + $0x258] sm:$0xff]  ;;  %v577_v60 = vld [vmem:[#allocation6 + $0x260] sm:$0xff] }
  0x70   : > { %v574_v55 = vld [vmem:[#allocation6 + $0x248] sm:$0xff]  ;;  %v563_v2 = vld [vmem:[#allocation2 + $0xc] sm:$0xff] }
  0x71   : > { %1067 = vmatpush3.bf16.msra.mxu1 %v1064_v44  ;;  %v184_v44 = vld [vmem:[#allocation2 + $0x8] sm:$0xff]  ;;  %v578_v61 = vld [vmem:[#allocation6 + $0x268] sm:$0xff] }
  0x72   : > { %1131 = vmatpush3.bf16.msra.mxu0 %v1128_v45  ;;  %1069 = vmatprep.subr.bf16.mxu1 %v1068_v50  ;;  %v467_v45 = vld [vmem:[#allocation2 + $0xb] sm:$0xff] }
  0x73   : > { %1133 = vmatprep.subr.bf16.mxu0 %v1132_v51 }
  0x75   : > { %1071 = vmatpush3.bf16.msra.mxu1 %v1068_v50  ;;  %v1176_v50 = vpack.c.bf16 %v570_v49, %v569_v48 }
  0x76   : > { %1135 = vmatpush3.bf16.msra.mxu0 %v1132_v51  ;;  %1073 = vmatprep.subr.bf16.mxu1 %v1072_v56  ;;  %v571_v51 = vld [vmem:[#allocation6 + $0x230] sm:$0xff] }
  0x77   : > { %1137 = vmatprep.subr.bf16.mxu0 %v1136_v57  ;;  %v1180_v53 = vpack.c.bf16 %v572_v52, %v571_v51 }
  0x78   : > { %898 = vmatmul.mubr.f32.vlgmr.msra.gmra.mrb[0].mxu1 %v202_v62  ;;  %v1192_v62 = vpack.c.bf16 %v578_v61, %v577_v60 }
  0x79   : > { %1075 = vmatpush3.bf16.msra.mxu1 %v1072_v56  ;;  %968 = vmatmul.mubr.f32.vlgmr.msra.gmra.mrb[0].mxu0 %v1586_v30  ;;  %v482_v30 = vld [vmem:[#allocation6 + $0x1e8] sm:$0xff]  ;;  %v1184_v56 = vpack.c.bf16 %v574_v55, %v573_v54 }
  0x7a   : > { %1139 = vmatpush3.bf16.msra.mxu0 %v1136_v57  ;;  %1077 = vmatprep.subr.bf16.mxu1 %v1076_v63  ;;  %v1160_v32 = vpack.c.bf16 %v482_v30, %v481_v29  ;;  %v575_v57 = vld [vmem:[#allocation6 + $0x250] sm:$0xff] }
  0x7b   : > { %1141 = vmatprep.subr.bf16.mxu0 %v1140_v0  ;;  %932 = vmatprep.mubr.f32.mxu1 %v183_v5  ;;  %v1188_v59 = vpack.c.bf16 %v576_v58, %v575_v57 }
  0x7c   : > { %1002 = vmatprep.mubr.f32.mxu0 %v466_v6 }
  0x7d   : > { %1079 = vmatpush3.bf16.msra.mxu1 %v1076_v63  ;;  %v579_v63 = vld [vmem:[#allocation6 + $0x270] sm:$0xff] }
  0x7e   : > { %1143 = vmatpush3.bf16.msra.mxu0 %v1140_v0  ;;  %1081 = vmatprep.subr.bf16.mxu1 %v1080_v7  ;;  %v580_v0 = vld [vmem:[#allocation6 + $0x278] sm:$0xff] }
  0x7f   : > { %1145 = vmatprep.subr.bf16.mxu0 %v1144_v8  ;;  %v1196_v1 = vpack.c.bf16 %v580_v0, %v579_v63 }
  0x81   : > { %1083 = vmatpush3.bf16.msra.mxu1 %v1080_v7 }
  0x82   : > { %1147 = vmatpush3.bf16.msra.mxu0 %v1144_v8  ;;  %1085 = vmatprep.subr.bf16.mxu1 %v1084_v13 }
  0x83   : > { %1149 = vmatprep.subr.bf16.mxu0 %v1148_v14 }
  0x85   : > { %1087 = vmatpush3.bf16.msra.mxu1 %v1084_v13 }
  0x86   : > { %1151 = vmatpush3.bf16.msra.mxu0 %v1148_v14  ;;  %1089 = vmatprep.subr.bf16.mxu1 %v1088_v19 }
  0x87   : > { %1153 = vmatprep.subr.bf16.mxu0 %v1152_v20 }
  0x89   : > { %1091 = vmatpush3.bf16.msra.mxu1 %v1088_v19 }
  0x8a   : > { %1155 = vmatpush3.bf16.msra.mxu0 %v1152_v20  ;;  %1093 = vmatprep.subr.bf16.mxu1 %v1092_v25 }
  0x8b   : > { %1157 = vmatprep.subr.bf16.mxu0 %v1156_v26 }
  0x8d   : > { %1095 = vmatpush3.bf16.msra.mxu1 %v1092_v25 }
  0x8e   : > { %1159 = vmatpush3.bf16.msra.mxu0 %v1156_v26  ;;  %1097 = vmatprep.subr.bf16.mxu1 %v1096_v31 }
  0x8f   : > { %1161 = vmatprep.subr.bf16.mxu0 %v1160_v32 }
  0x91   : > { %1099 = vmatpush3.bf16.msra.mxu1 %v1096_v31 }
  0x92   : > { %1163 = vmatpush3.bf16.msra.mxu0 %v1160_v32  ;;  %1101 = vmatprep.subr.bf16.mxu1 %v1100_v37 }
  0x93   : > { %1165 = vmatprep.subr.bf16.mxu0 %v1164_v38 }
  0x95   : > { %1103 = vmatpush3.bf16.msra.mxu1 %v1100_v37 }
  0x96   : > { %1167 = vmatpush3.bf16.msra.mxu0 %v1164_v38 }
  0x97   : > { %1169 = vmatprep.subr.bf16.mxu0 %v1168_v41 }
  0x98   : > { %933 = vmatmul.mubr.f32.vlgmr.msra.gmra.mrb[0].mxu1 %v184_v44 }
  0x99   : > { %1003 = vmatmul.mubr.f32.vlgmr.msra.gmra.mrb[0].mxu0 %v467_v45 }
  0x9a   : > { %1171 = vmatpush3.bf16.msra.mxu0 %v1168_v41  ;;  %1037 = vmatprep.mubr.f32.mxu0 %v562_v47 }
  0x9b   : > { %1173 = vmatprep.subr.bf16.mxu0 %v1172_v46 }
  0x9e   : > { %1175 = vmatpush3.bf16.msra.mxu0 %v1172_v46 }
  0x9f   : > { %1177 = vmatprep.subr.bf16.mxu0 %v1176_v50 }
  0xa2   : > { %1179 = vmatpush3.bf16.msra.mxu0 %v1176_v50 }
  0xa3   : > { %1181 = vmatprep.subr.bf16.mxu0 %v1180_v53 }
  0xa6   : > { %1183 = vmatpush3.bf16.msra.mxu0 %v1180_v53 }
  0xa7   : > { %1185 = vmatprep.subr.bf16.mxu0 %v1184_v56 }
  0xaa   : > { %1187 = vmatpush3.bf16.msra.mxu0 %v1184_v56 }
  0xab   : > { %1189 = vmatprep.subr.bf16.mxu0 %v1188_v59 }
  0xae   : > { %1191 = vmatpush3.bf16.msra.mxu0 %v1188_v59 }
  0xaf   : > { %1193 = vmatprep.subr.bf16.mxu0 %v1192_v62 }
  0xb2   : > { %1195 = vmatpush3.bf16.msra.mxu0 %v1192_v62 }
  0xb3   : > { %1197 = vmatprep.subr.bf16.mxu0 %v1196_v1 }
  0xb6   : > { %1199 = vmatpush3.bf16.msra.mxu0 %v1196_v1 }
  0xb9   : > { %1038 = vmatmul.mubr.f32.vlgmr.msra.gmra.mrb[0].mxu0 %v563_v2 }
 0x16b   : > { %v934_v3 = vpop.f32.mrb[0].mxu1 }
 0x16c   : > { %v361_v4 = vpop.f32.mrb[1].mxu1 }
 0x18c   : > { %v1039_v5 = vpop.f32.mrb[0].mxu0 }
 0x18d   : > { %v1200_v6 = vadd.f32 %v1039_v5, %v934_v3  ;;  %v647_v7 = vpop.f32.mrb[1].mxu0 }
 0x18e   : > { %v1201_v8 = vadd.f32 %v647_v7, %v361_v4 }
 0x18f   : > { %659 = vst [vmem:[%s176_s15 + $0x8] sm:$0xff] %v1200_v6 }
 0x190   : > { %658 = vst [vmem:[%s176_s15] sm:$0xff] %v1201_v8 }
 0x191   : > { %1341 = shalt.err (!%p1338_p7)
}
 0x192   : > { %s1342_s20 = scalar_lea.hbm %s1598_s22, 256  ;;  %s1346_s25 = scalar_lea.hbm %s1644_s2, 512 }
 0x193   : > { %p1343_p9 = scmp.ne.s32.totalorder %s1598_s22, %s1342_s20  ;;  %p1347_p5 = scmp.lt.u32.totalorder %s1598_s22, %s1644_s2 }
 0x194   : > { %p1348_p11 = scmp.lt.u32.totalorder %s1346_s25, %s1342_s20  ;;  %p1350_p4 = scmp.lt.u32.totalorder %s1342_s20, %s1598_s22 }
 0x195   : > { %p1344_p1 = pnand %p1343_p9, %p1517_p12 }
 0x196   : > { %p1349_p2 = por %p1348_p11, %p1347_p5 }
 0x197   : > { %p1345_p0 = pneg %p1344_p1 }
 0x198   : > { %p1351_p6 = por %p1350_p4, %p1349_p2 }
 0x19a   : > { %p1352_p8 = pnand %p1351_p6, %p1345_p0 }
 0x19c   : > { %1355 = shalt.err (!%p1352_p8)
}
 0x19d   : > { %s1406_s30 = smov 128   ;;  %s1407_s23 = smov 8  }
 0x19e   : > { %1214 = dma.vmem_to_hbm [thread:$0]  (%p1517_p12), %s1593_s17, 256, %s1598_s22, %s661_s28, %s1406_s30, %s1406_s30, %s1407_s23  }
 0x19f PF: > { %s689_s15 = sand.u32 1, %s1386_s9   ;;  %p1659_p10 = scmp.ne.s32.totalorder %s1649_s16, 0 }
 0x1a0   : > { %p1660_p13 = scmp.ge.s32.totalorder %s1398_s12, 2  ;;  %s690_s4 = scalar_lea.sflag [#allocation5], %s689_s15 }
 0x1a2   : > { %p1225_p3 = pnand %p1660_p13, %p1659_p10 }
 0x1a4   : > { %1381 = dma.done.wait (!%p1225_p3), %s690_s4, 256  }
 0x1a5   : > { %1383 = vsyncadd (!%p1225_p3), %s690_s4, 4294967040  ;;  %p16_p7 = scmp.ge.s32.totalorder %s1479_s21, 4   ;;  %s1661_s9 = smov %s1390_s10 }
 0x1a6   : > { %s1662_s10 = smov %s1394_s11  ;;  %s1663_s11 = smov %s1513_s8 }
 0x1a7   : > { %s1664_s12 = smov %s1479_s21  ;;  %18 = sbr.rel (!%p16_p7) target bundleno = 6 (0x6), region = 81 }
 0x1ae   :  { %695 = vsyncpa [#allocation4], 1 }
 0x1af   :  { %697 = vsyncpa [#allocation4 + $0x1], 1 }
 0x1b0   :  { %698 = vsyncpa [#allocation7], 1 }
 0x1b1   :  { %699 = vsyncpa [#allocation5], 1 }
 0x1b2   :  { %701 = vsyncpa [#allocation5 + $0x1], 1 }

</bundles_post_ra>
